<compile_context>
chip_gen: v6e
topology: v6e:2x2x1
jax: 0.10.0
libtpu: 0.0.40
codegen_flags: <defaults>
</compile_context>

<pallas_src>
import functools
import math
from typing import NamedTuple

import jax
import jax.numpy as jnp
from jax.experimental import pallas as pl
from jax.experimental.pallas import tpu as pltpu


def _round_up(x, m):
    return int(pl.cdiv(int(x), m)) * m


@functools.lru_cache(maxsize=1)
def _vmem_capacity_bytes():
    """Per-TensorCore VMEM capacity; conservative 64 MiB (v7x) fallback."""
    try:
        info = pltpu.get_tpu_info()
        cap = int(getattr(info, "vmem_capacity_bytes", 0) or 0)
        if cap > 0:
            return cap
    except Exception:
        pass
    return 64 * 1024 * 1024


# --------------------------------------------------------------------------------------
# Kernels
# --------------------------------------------------------------------------------------
def _ffn_kernel_resident(x_ref, w1_ref, b1_ref, w2_ref, b2_ref, o_ref):
    # Full weights resident in VMEM (grid-invariant); single pass per row block.
    h = jnp.dot(x_ref[...], w1_ref[...], preferred_element_type=jnp.float32)
    h = jnp.maximum(h + b1_ref[...], 0.0)
    out = jnp.dot(h.astype(w2_ref.dtype), w2_ref[...],
                  preferred_element_type=jnp.float32)
    o_ref[...] = (out + b2_ref[...]).astype(o_ref.dtype)


def _ffn_kernel_htiled_f32out(x_ref, w1_ref, b1_ref, w2_ref, b2_ref, o_ref):
    # H-tiled reduction; float32 output block is resident across j -> accumulate in place.
    j = pl.program_id(1)

    @pl.when(j == 0)
    def _init():
        o_ref[...] = jnp.broadcast_to(b2_ref[...], o_ref.shape)

    h = jnp.dot(x_ref[...], w1_ref[...], preferred_element_type=jnp.float32)
    h = jnp.maximum(h + b1_ref[...], 0.0)
    o_ref[...] += jnp.dot(h.astype(w2_ref.dtype), w2_ref[...],
                          preferred_element_type=jnp.float32)


def _ffn_kernel_htiled_acc(x_ref, w1_ref, b1_ref, w2_ref, b2_ref, o_ref, acc_ref):
    # H-tiled reduction with an f32 VMEM accumulator (narrow output dtypes).
    j = pl.program_id(1)

    @pl.when(j == 0)
    def _init():
        acc_ref[...] = jnp.broadcast_to(b2_ref[...], acc_ref.shape)

    h = jnp.dot(x_ref[...], w1_ref[...], preferred_element_type=jnp.float32)
    h = jnp.maximum(h + b1_ref[...], 0.0)
    acc_ref[...] += jnp.dot(h.astype(w2_ref.dtype), w2_ref[...],
                            preferred_element_type=jnp.float32)

    @pl.when(j == pl.num_programs(1) - 1)
    def _finalize():
        o_ref[...] = acc_ref[...].astype(o_ref.dtype)


# --------------------------------------------------------------------------------------
# Parameter preparation (done ONCE at load time, not per call)
# --------------------------------------------------------------------------------------
class FFNParams(NamedTuple):
    w1p: jax.Array  # (Dp, Hp) compute dtype
    b1p: jax.Array  # (1, Hp)  float32
    w2p: jax.Array  # (Hp, Dp) compute dtype
    b2p: jax.Array  # (1, Dp)  float32


def prepare_ffn_params(w1, b1, w2, b2, compute_dtype=jnp.bfloat16):
    """Pad to lane-dense multiples of 128 and cast MXU operands once.

    w1: (D, H), b1: (H,), w2: (H, D), b2: (D,) — weights stored (in, out), i.e.
    transposed relative to torch.nn.Linear.weight.
    """
    D, H = w1.shape
    Dp, Hp = _round_up(D, 128), _round_up(H, 128)
    w1p = jnp.pad(jnp.asarray(w1).astype(compute_dtype), ((0, Dp - D), (0, Hp - H)))
    w2p = jnp.pad(jnp.asarray(w2).astype(compute_dtype), ((0, Hp - H), (0, Dp - D)))
    b1p = jnp.pad(jnp.asarray(b1).astype(jnp.float32), (0, Hp - H)).reshape(1, Hp)
    b2p = jnp.pad(jnp.asarray(b2).astype(jnp.float32), (0, Dp - D)).reshape(1, Dp)
    return FFNParams(w1p, b1p, w2p, b2p)


# --------------------------------------------------------------------------------------
# Fused FFN entry point
# --------------------------------------------------------------------------------------
@functools.partial(jax.jit, static_argnames=("block_rows", "block_h", "force_h_tiling"))
def feed_forward(x, params: FFNParams, *, block_rows=None, block_h=512,
                 force_h_tiling=False):
    """Fused eval-mode FFN: relu(x @ w1 + b1) @ w2 + b2 (Dropout = identity)."""
    # TODO(synk): training-mode dropout (pltpu.prng_seed + prng_random_bits mask) not implemented.
    D = x.shape[-1]
    rows = math.prod(x.shape[:-1])
    out_dtype = x.dtype
    cdt = params.w1p.dtype
    Dp, Hp = params.w1p.shape
    isz = jnp.dtype(cdt).itemsize
    osz = jnp.dtype(out_dtype).itemsize

    vmem_cap = _vmem_capacity_bytes()
    usable = vmem_cap - (8 << 20)                    # headroom for internal scratch

    # Sublane multiple of the row dim for x / output blocks (bf16 -> 16, 8-bit -> 32).
    sub = max(8, 32 // isz, 32 // osz)

    if block_rows is None:
        # Bigger row tiles on 128 MiB VMEM parts (v5e/v6e); capped for v7x's 64 MiB.
        block_rows = 768 if vmem_cap >= (100 << 20) else 512
    tm = max(sub, min(_round_up(block_rows, sub), _round_up(rows, sub)))

    # Megacore: keep >= 2 row blocks when rows allow so the "parallel" axis shards over TCs.
    rows_sub = _round_up(rows, sub)
    if rows_sub >= 512 and rows_sub <= tm:
        tm = max(sub, _round_up(pl.cdiv(rows_sub, 2), sub))

    # Hidden-dim tile for the streamed fallback; must divide Hp (Hp is a multiple of 128).
    th = min(_round_up(block_h, 128), Hp)
    while Hp % th != 0:
        th -= 128

    use_scratch = bool(out_dtype != jnp.float32)

    def _est(tm_, resident_):
        if resident_:
            return (2 * tm_ * Dp * isz              # x block (double-buffered)
                    + 2 * Dp * Hp * isz             # W1 (budget 2 buffers; safe)
                    + 2 * Hp * Dp * isz             # W2
                    + 2 * (Hp + Dp) * 4             # biases (f32)
                    + 2 * tm_ * Dp * osz            # out block
                    + tm_ * Hp * 4                  # f32 GEMM-1 intermediate
                    + tm_ * Hp * isz)               # cast copy fed to GEMM-2
        return (2 * tm_ * Dp * isz
                + 2 * Dp * th * isz                 # W1 slab
                + 2 * th * Dp * isz                 # W2 slab
                + 2 * (th + Dp) * 4                 # bias chunks
                + 2 * tm_ * Dp * osz
                + tm_ * th * 4                      # f32 GEMM-1 intermediate
                + tm_ * th * isz                    # cast copy
                + (tm_ * Dp * 4 if use_scratch else 0))

    # Prefer VMEM-resident weights (read from HBM exactly once) when they fit.
    resident = (not force_h_tiling) and (4 * Dp * Hp * isz) <= int(0.55 * vmem_cap)
    if resident:
        tm_r = tm
        while _est(tm_r, True) > usable and tm_r > sub:
            tm_r = max(sub, _round_up(tm_r // 2, sub))
        if _est(tm_r, True) <= usable:
            tm = tm_r
        else:
            resident = False
    if not resident:
        while _est(tm, False) > usable and tm > sub:
            tm = max(sub, _round_up(tm // 2, sub))

    rows_p = _round_up(rows, tm)
    n_rb = rows_p // tm
    n_hb = Hp // th

    x2 = jnp.pad(jnp.reshape(x, (rows, D)).astype(cdt),
                 ((0, rows_p - rows), (0, Dp - D)))

    vmem_bytes = _est(tm, resident)
    vmem_limit = int(min(vmem_cap - (2 << 20),
                         max(vmem_bytes + (4 << 20), 16 << 20)))

    weight_bytes = (params.w1p.size + params.w2p.size) * isz
    cost = pl.CostEstimate(
        flops=4 * rows_p * Dp * Hp,                 # two GEMMs, 2 flops / MAC
        transcendentals=0,
        bytes_accessed=int(x2.size * isz
                           + (params.b1p.size + params.b2p.size) * 4
                           + (weight_bytes if resident else n_rb * weight_bytes)
                           + rows_p * Dp * osz))

    if resident:
        grid = (n_rb,)
        in_specs = [
            pl.BlockSpec((tm, Dp), lambda i: (i, 0)),     # x row block
            pl.BlockSpec((Dp, Hp), lambda i: (0, 0)),     # W1 (grid-invariant)
            pl.BlockSpec((1, Hp), lambda i: (0, 0)),      # b1
            pl.BlockSpec((Hp, Dp), lambda i: (0, 0)),     # W2 (grid-invariant)
            pl.BlockSpec((1, Dp), lambda i: (0, 0)),      # b2
        ]
        out_specs = pl.BlockSpec((tm, Dp), lambda i: (i, 0))
        kernel, scratch, dim_sem = _ffn_kernel_resident, [], ("parallel",)
    else:
        grid = (n_rb, n_hb)
        in_specs = [
            pl.BlockSpec((tm, Dp), lambda i, j: (i, 0)),  # x row block (resident over j)
            pl.BlockSpec((Dp, th), lambda i, j: (0, j)),  # W1 H-slab (streamed)
            pl.BlockSpec((1, th), lambda i, j: (0, j)),   # b1 H-chunk
            pl.BlockSpec((th, Dp), lambda i, j: (j, 0)),  # W2 H-slab (streamed)
            pl.BlockSpec((1, Dp), lambda i, j: (0, 0)),   # b2 (grid-invariant, tiny)
        ]
        out_specs = pl.BlockSpec((tm, Dp), lambda i, j: (i, 0))
        if use_scratch:
            kernel, scratch = _ffn_kernel_htiled_acc, [pltpu.VMEM((tm, Dp), jnp.float32)]
        else:
            kernel, scratch = _ffn_kernel_htiled_f32out, []
        dim_sem = ("parallel", "arbitrary")

    out = pl.pallas_call(
        kernel,
        out_shape=jax.ShapeDtypeStruct((rows_p, Dp), out_dtype),
        grid_spec=pltpu.PrefetchScalarGridSpec(
            num_scalar_prefetch=0,
            grid=grid,
            in_specs=in_specs,
            out_specs=out_specs,
            scratch_shapes=scratch,
        ),
        compiler_params=pltpu.CompilerParams(
            dimension_semantics=dim_sem,
            vmem_limit_bytes=vmem_limit,
        ),
        cost_estimate=cost,
    )(x2, params.w1p, params.b1p, params.w2p, params.b2p)

    return out[:rows, :D].reshape(x.shape)


def feed_forward_dense(x, w1, b1, w2, b2, *, compute_dtype=jnp.bfloat16, **kwargs):
    """Convenience path (pads/casts weights per call). Prefer prepare_ffn_params()."""
    return feed_forward(x, prepare_ffn_params(w1, b1, w2, b2, compute_dtype), **kwargs)


# --------------------------------------------------------------------------------------
# Reference & demo
# --------------------------------------------------------------------------------------
def _reference(x, w1, b1, w2, b2, compute_dtype=jnp.float32):
    f32 = jnp.float32
    xf = x.astype(compute_dtype).astype(f32)
    w1f = w1.astype(compute_dtype).astype(f32)
    w2f = w2.astype(compute_dtype).astype(f32)
    h = jnp.maximum(xf @ w1f + b1.astype(f32), 0.0)
    h = h.astype(compute_dtype).astype(f32)
    return (h @ w2f + b2.astype(f32)).astype(x.dtype)


if __name__ == "__main__":
    # Small shapes implied by the module: batch=2, seq=8, embedding_dim=32 -> hidden=128.
    B, T, D = 2, 8, 32
    H = 4 * D
    dtype = jnp.float32

    key = jax.random.PRNGKey(0)
    kx, k1, k2, k3, k4 = jax.random.split(key, 5)

    x = jax.random.normal(kx, (B, T, D), dtype=dtype)

    # Deterministic param init (PyTorch-Linear-style uniform bounds); weights stored
    # pre-transposed for the kernel: W1 is (D, H), W2 is (H, D).
    bound1 = 1.0 / jnp.sqrt(D)
    bound2 = 1.0 / jnp.sqrt(H)
    w1 = jax.random.uniform(k1, (D, H), dtype=dtype, minval=-bound1, maxval=bound1)
    b1 = jax.random.uniform(k2, (H,), dtype=dtype, minval=-bound1, maxval=bound1)
    w2 = jax.random.uniform(k3, (H, D), dtype=dtype, minval=-bound2, maxval=bound2)
    b2 = jax.random.uniform(k4, (D,), dtype=dtype, minval=-bound2, maxval=bound2)

    # Default fast path: bf16 MXU operands, f32 accumulation, weights prepared once.
    params_bf16 = prepare_ffn_params(w1, b1, w2, b2)              # bf16 default
    y_bf = jax.block_until_ready(feed_forward(x, params_bf16))
    y_bf_ref = _reference(x, w1, b1, w2, b2, compute_dtype=jnp.bfloat16)
    assert y_bf.shape == (B, T, D)
    assert jnp.allclose(y_bf, y_bf_ref, atol=3e-2, rtol=3e-2), "bf16 mismatch vs reference"

    # Full-precision path.
    params_f32 = prepare_ffn_params(w1, b1, w2, b2, compute_dtype=jnp.float32)
    y = jax.block_until_ready(feed_forward(x, params_f32))
    y_ref = _reference(x, w1, b1, w2, b2)
    assert jnp.allclose(y, y_ref, atol=1e-5, rtol=1e-5), "f32 mismatch vs reference"

    # Ragged-row case (rows not a multiple of the row tile) exercises the pad/slice path.
    x_odd = jax.random.normal(kx, (B, 5, D), dtype=dtype)
    y_odd = jax.block_until_ready(feed_forward(x_odd, params_f32))
    assert jnp.allclose(y_odd, _reference(x_odd, w1, b1, w2, b2), atol=1e-5, rtol=1e-5), \
        "ragged-row mismatch vs reference"

    # Force the H-tiled (streamed-weight) path: f32 output accumulates into o_ref.
    y_ht = jax.block_until_ready(feed_forward(x, params_f32, force_h_tiling=True))
    assert jnp.allclose(y_ht, y_ref, atol=1e-5, rtol=1e-5), "H-tiled f32 mismatch"

    # Force the H-tiled path with a narrow output dtype: f32 scratch accumulator kernel.
    x_bf = x.astype(jnp.bfloat16)
    y_ht_bf = jax.block_until_ready(feed_forward(x_bf, params_bf16, force_h_tiling=True))
    y_ht_bf_ref = _reference(x_bf, w1, b1, w2, b2, compute_dtype=jnp.bfloat16)
    assert jnp.allclose(y_ht_bf.astype(jnp.float32), y_ht_bf_ref.astype(jnp.float32),
                        atol=5e-2, rtol=5e-2), "H-tiled bf16-out mismatch"

    print("KERNEL_OK")
</pallas_src>

<mosaic_0001>
module attributes {stable_mosaic.version = 11 : i64} {
  func.func @_ffn_kernel_resident(%arg0: i32, %arg1: memref<16x128xbf16, #tpu.memory_space<vmem>>, %arg2: memref<128x128xbf16, #tpu.memory_space<vmem>>, %arg3: memref<1x128xf32, #tpu.memory_space<vmem>>, %arg4: memref<128x128xbf16, #tpu.memory_space<vmem>>, %arg5: memref<1x128xf32, #tpu.memory_space<vmem>>, %arg6: memref<16x128xf32, #tpu.memory_space<vmem>>) attributes {dimension_semantics = [#tpu.dimension_semantics<parallel>], iteration_bounds = array<i64: 1>, scalar_prefetch = 0 : i64, scratch_operands = 0 : i64, tpu.core_type = #tpu.core_type<tc>, window_params = [{transform_indices = @transform_0, window_bounds = array<i64: 16, 128>}, {pipeline_mode = #tpu.pipeline_mode<synchronous>, transform_indices = @transform_1, window_bounds = array<i64: 128, 128>}, {pipeline_mode = #tpu.pipeline_mode<synchronous>, transform_indices = @transform_2, window_bounds = array<i64: 1, 128>}, {pipeline_mode = #tpu.pipeline_mode<synchronous>, transform_indices = @transform_3, window_bounds = array<i64: 128, 128>}, {pipeline_mode = #tpu.pipeline_mode<synchronous>, transform_indices = @transform_4, window_bounds = array<i64: 1, 128>}, {transform_indices = @transform_5, window_bounds = array<i64: 16, 128>}]} {
    %c0 = arith.constant 0 : index
    %c0_0 = arith.constant 0 : index
    %0 = vector.load %arg1[%c0, %c0_0] : memref<16x128xbf16, #tpu.memory_space<vmem>>, vector<16x128xbf16>
    %c0_1 = arith.constant 0 : index
    %c0_2 = arith.constant 0 : index
    %1 = vector.load %arg2[%c0_1, %c0_2] : memref<128x128xbf16, #tpu.memory_space<vmem>>, vector<128x128xbf16>
    %cst = arith.constant dense<0.000000e+00> : vector<16x128xf32>
    %2 = tpu.matmul %0, %1, %cst {dimension_numbers = #tpu.dot_dimension_numbers<[1], [0], [0], [1], [0, 0, 1, 1], [], []>} : vector<16x128xbf16>, vector<128x128xbf16>, vector<16x128xf32> -> vector<16x128xf32>
    %c0_3 = arith.constant 0 : index
    %c0_4 = arith.constant 0 : index
    %3 = vector.load %arg3[%c0_3, %c0_4] : memref<1x128xf32, #tpu.memory_space<vmem>>, vector<1x128xf32>
    %4 = vector.broadcast %3 : vector<1x128xf32> to vector<16x128xf32>
    %5 = arith.addf %2, %4 : vector<16x128xf32>
    %cst_5 = arith.constant 0.000000e+00 : f32
    %6 = vector.broadcast %cst_5 : f32 to vector<16x128xf32>
    %7 = arith.maximumf %5, %6 : vector<16x128xf32>
    %8 = arith.truncf %7 : vector<16x128xf32> to vector<16x128xbf16>
    %c0_6 = arith.constant 0 : index
    %c0_7 = arith.constant 0 : index
    %9 = vector.load %arg4[%c0_6, %c0_7] : memref<128x128xbf16, #tpu.memory_space<vmem>>, vector<128x128xbf16>
    %cst_8 = arith.constant dense<0.000000e+00> : vector<16x128xf32>
    %10 = tpu.matmul %8, %9, %cst_8 {dimension_numbers = #tpu.dot_dimension_numbers<[1], [0], [0], [1], [0, 0, 1, 1], [], []>} : vector<16x128xbf16>, vector<128x128xbf16>, vector<16x128xf32> -> vector<16x128xf32>
    %c0_9 = arith.constant 0 : index
    %c0_10 = arith.constant 0 : index
    %11 = vector.load %arg5[%c0_9, %c0_10] : memref<1x128xf32, #tpu.memory_space<vmem>>, vector<1x128xf32>
    %12 = vector.broadcast %11 : vector<1x128xf32> to vector<16x128xf32>
    %13 = arith.addf %10, %12 : vector<16x128xf32>
    %c0_11 = arith.constant 0 : index
    %c0_12 = arith.constant 0 : index
    %14 = vector.load %arg6[%c0_11, %c0_12] : memref<16x128xf32, #tpu.memory_space<vmem>>, vector<16x128xf32>
    tpu.vector_store %arg6[%c0_11, %c0_12], %13 {strides = array<i32>} : memref<16x128xf32, #tpu.memory_space<vmem>>, vector<16x128xf32>,
    return
  }
  func.func @transform_0(%arg0: i32) -> (i32, i32) {
    %c0_i32 = arith.constant 0 : i32
    %c0_i32_0 = arith.constant 0 : i32
    return %arg0, %c0_i32 : i32, i32
  }
  func.func @transform_1(%arg0: i32) -> (i32, i32) {
    %c0_i32 = arith.constant 0 : i32
    %c0_i32_0 = arith.constant 0 : i32
    %c0_i32_1 = arith.constant 0 : i32
    return %c0_i32, %c0_i32_0 : i32, i32
  }
  func.func @transform_2(%arg0: i32) -> (i32, i32) {
    %c0_i32 = arith.constant 0 : i32
    %c0_i32_0 = arith.constant 0 : i32
    %c0_i32_1 = arith.constant 0 : i32
    return %c0_i32, %c0_i32_0 : i32, i32
  }
  func.func @transform_3(%arg0: i32) -> (i32, i32) {
    %c0_i32 = arith.constant 0 : i32
    %c0_i32_0 = arith.constant 0 : i32
    %c0_i32_1 = arith.constant 0 : i32
    return %c0_i32, %c0_i32_0 : i32, i32
  }
  func.func @transform_4(%arg0: i32) -> (i32, i32) {
    %c0_i32 = arith.constant 0 : i32
    %c0_i32_0 = arith.constant 0 : i32
    %c0_i32_1 = arith.constant 0 : i32
    return %c0_i32, %c0_i32_0 : i32, i32
  }
  func.func @transform_5(%arg0: i32) -> (i32, i32) {
    %c0_i32 = arith.constant 0 : i32
    %c0_i32_0 = arith.constant 0 : i32
    return %arg0, %c0_i32 : i32, i32
  }
}

</mosaic_0001>

<bundles_post_ra>
// kernel: feed_forward.1
= control target key start
LH: loop header
LB: loop body
LE: loop exit
PB: predicated region body
PF: predicated region fallthrough
CT: control target
= control target key end

     0   :  { %10 = vsyncpa [#allocation3], 0  ;;  %s493_s0 = inlined_call_operand.vmem [shape: bf16[16,128], index: 0, kind: input, shape index: {}]   ;;  %s494_s1 = inlined_call_operand.hbm [shape: bf16[128,128], index: 1, kind: input, shape index: {}]   ;;  %s495_s2 = inlined_call_operand.vmem [shape: f32[1,128], index: 2, kind: input, shape index: {}]   ;;  %s496_s3 = inlined_call_operand.hbm [shape: bf16[128,128], index: 3, kind: input, shape index: {}]   ;;  %s497_s4 = inlined_call_operand.vmem [shape: f32[1,128], index: 4, kind: input, shape index: {}]   ;;  %s498_s5 = inlined_call_operand.vmem [shape: f32[16,128], index: 5, kind: output, shape index: {}]  }
   0x1   :  { %11 = vsyncpa [#allocation5], 0  ;;  %s436_s18 = smov [#allocation2]  }
   0x2   :  { %s19_s19 = sshll.u32 %s436_s18, 4  ;;  %s20_s19 = int_to_ptr.vmem [resolvable:$true] %s19_s19 }
   0x3   :  { %s400_s20 = scalar_lea.vmem %s20_s19, 1024  ;;  %p405_p1 = scmp.lt.s32.totalorder %s20_s19, %s20_s19 }
   0x4   :  { %p401_p0 = scmp.ne.s32.totalorder %s20_s19, %s400_s20  ;;  %p406_p2 = scmp.lt.s32.totalorder %s400_s20, %s400_s20 }
   0x6   :  { %p407_p3 = por %p406_p2, %p405_p1 }
   0x8   :  { %p408_p4 = pnand %p407_p3, %p401_p0 }
   0xa   :  { %411 = shalt.err (!%p408_p4)
}
   0xb   :  { %s437_s21 = smov 64   ;;  %s438_s22 = smov 4  }
   0xc   :  { %25 = dma.hbm_to_vmem [thread:$0]  %s494_s1, 1024, %s20_s19, [#allocation3], %s437_s21, %s437_s21, %s438_s22  }
   0xd   :  { %s439_s25 = smov [#allocation4]  }
   0xe   :  { %s33_s26 = sshll.u32 %s439_s25, 4  ;;  %s34_s26 = int_to_ptr.vmem [resolvable:$true] %s33_s26 }
   0xf   :  { %s420_s27 = scalar_lea.vmem %s34_s26, 1024  ;;  %p425_p6 = scmp.lt.s32.totalorder %s34_s26, %s34_s26 }
  0x10   :  { %p421_p5 = scmp.ne.s32.totalorder %s34_s26, %s420_s27  ;;  %p426_p7 = scmp.lt.s32.totalorder %s420_s27, %s420_s27 }
  0x12   :  { %p427_p8 = por %p426_p7, %p425_p6 }
  0x14   :  { %p428_p9 = pnand %p427_p8, %p421_p5 }
  0x16   :  { %431 = shalt.err (!%p428_p9)
}
  0x17   :  { %39 = dma.hbm_to_vmem [thread:$0]  %s496_s3, 1024, %s34_s26, [#allocation5], %s437_s21, %s437_s21, %s438_s22  }
  0x18   :  { %432 = dma.done.wait [#allocation3], 1024  }
  0x19   :  { %433 = vsyncadd [#allocation3], 4294966272 }
  0x1a   :  { %434 = dma.done.wait [#allocation5], 1024  }
  0x1b   :  { %435 = vsyncadd [#allocation5], 4294966272  ;;  %v440_v0 = vmov 0.0   ;;  %vm441_vm0 = vmmov 0   ;;  %v375_v1 = vld [vmem:[#allocation2 + $0x38] sm:$0xff]   ;;  %v376_v2 = vld [vmem:[#allocation2 + $0x30] sm:$0xff]  }
  0x1c   :  { %329 = vmatprep.subr.bf16.mxu0 %v440_v0  ;;  %345 = vmatprep.mubr.msk.bf16.mxu0 %vm441_vm0, %v440_v0  ;;  %v377_v3 = vld [vmem:[#allocation2 + $0x28] sm:$0xff]   ;;  %v384_v4 = vld [vmem:[#allocation4 + $0x38] sm:$0xff]   ;;  %v378_v5 = vld [vmem:[#allocation2 + $0x20] sm:$0xff]  }
  0x1d   :  { %349 = vmatprep.subr.bf16.mxu1 %v440_v0  ;;  %365 = vmatprep.mubr.msk.bf16.mxu1 %vm441_vm0, %v440_v0  ;;  %v385_v6 = vld [vmem:[#allocation4 + $0x30] sm:$0xff]   ;;  %v379_v7 = vld [vmem:[#allocation2 + $0x18] sm:$0xff]   ;;  %v386_v8 = vld [vmem:[#allocation4 + $0x28] sm:$0xff]  }
  0x1e   :  { %330 = vmatpush3.bf16.msra.mxu0 %v375_v1  ;;  %350 = vmatpush3.bf16.msra.mxu1 %v384_v4  ;;  %v380_v9 = vld [vmem:[#allocation2 + $0x10] sm:$0xff]   ;;  %v387_v10 = vld [vmem:[#allocation4 + $0x20] sm:$0xff]   ;;  %v381_v11 = vld [vmem:[#allocation2 + $0x8] sm:$0xff]  }
  0x1f   :  { %331 = vmatprep.subr.bf16.mxu0 %v440_v0  ;;  %351 = vmatprep.subr.bf16.mxu1 %v440_v0  ;;  %v388_v12 = vld [vmem:[#allocation4 + $0x18] sm:$0xff]   ;;  %v382_v13 = vld [vmem:[#allocation2] sm:$0xff]   ;;  %v389_v15 = vld [vmem:[#allocation4 + $0x10] sm:$0xff]  }
  0x20   :  { %v383_v14 = vld [vmem:[%s493_s0] sm:$0xff]   ;;  %v390_v16 = vld [vmem:[#allocation4 + $0x8] sm:$0xff]  }
  0x21   :  { %v391_v17 = vld [vmem:[#allocation4] sm:$0xff]  }
  0x22   :  { %332 = vmatpush3.bf16.msra.mxu0 %v376_v2  ;;  %352 = vmatpush3.bf16.msra.mxu1 %v385_v6  ;;  %v292_v18 = vld [vmem:[%s495_s2] ss:$0 sm:$0xff] }
  0x23   :  { %333 = vmatprep.subr.bf16.mxu0 %v440_v0  ;;  %353 = vmatprep.subr.bf16.mxu1 %v440_v0  ;;  %v302_v28 = vld [vmem:[%s497_s4] ss:$0 sm:$0xff] }
  0x26   :  { %334 = vmatpush3.bf16.msra.mxu0 %v377_v3  ;;  %354 = vmatpush3.bf16.msra.mxu1 %v386_v8 }
  0x27   :  { %335 = vmatprep.subr.bf16.mxu0 %v440_v0  ;;  %355 = vmatprep.subr.bf16.mxu1 %v440_v0 }
  0x2a   :  { %336 = vmatpush3.bf16.msra.mxu0 %v378_v5  ;;  %356 = vmatpush3.bf16.msra.mxu1 %v387_v10 }
  0x2b   :  { %337 = vmatprep.subr.bf16.mxu0 %v440_v0  ;;  %357 = vmatprep.subr.bf16.mxu1 %v440_v0 }
  0x2e   :  { %338 = vmatpush3.bf16.msra.mxu0 %v379_v7  ;;  %358 = vmatpush3.bf16.msra.mxu1 %v388_v12 }
  0x2f   :  { %339 = vmatprep.subr.bf16.mxu0 %v440_v0  ;;  %359 = vmatprep.subr.bf16.mxu1 %v440_v0 }
  0x32   :  { %340 = vmatpush3.bf16.msra.mxu0 %v380_v9  ;;  %360 = vmatpush3.bf16.msra.mxu1 %v389_v15 }
  0x33   :  { %341 = vmatprep.subr.bf16.mxu0 %v440_v0  ;;  %361 = vmatprep.subr.bf16.mxu1 %v440_v0 }
  0x36   :  { %342 = vmatpush3.bf16.msra.mxu0 %v381_v11  ;;  %362 = vmatpush3.bf16.msra.mxu1 %v390_v16 }
  0x37   :  { %343 = vmatprep.subr.bf16.mxu0 %v440_v0  ;;  %363 = vmatprep.subr.bf16.mxu1 %v440_v0 }
  0x3a   :  { %344 = vmatpush3.bf16.msra.mxu0 %v382_v13  ;;  %364 = vmatpush3.bf16.msra.mxu1 %v391_v17 }
  0x3d   :  { %346 = vmatmul.mubr.bf16.vlgmr.msra.gmra.mxu0 %v383_v14 }
  0xfd   :  { %v162_v19 = vpop.f32.mrf.mxu0 }
  0xfe   :  { %v163_v21 = vadd.f32 %v292_v18, %v162_v19 }
  0xff   :  { %v347_v20 = vpop.f32.mrf.mxu0 }
 0x100   :  { %v169_v25 = vmax.f32 %v163_v21, 0.0 }
 0x101   :  { %v165_v22 = vpop.f32.mrf.mxu0 }
 0x102   :  { %v166_v23 = vadd.f32 %v292_v18, %v165_v22 }
 0x103   :  { %v348_v24 = vpop.f32.mrf.mxu0 }
 0x104   :  { %v170_v26 = vmax.f32 %v166_v23, 0.0 }
 0x106   :  { %v171_v27 = vpack.c.bf16 %v170_v26, %v169_v25 }
 0x108   :  { %366 = vmatmul.mubr.bf16.vlgmr.msra.gmra.mxu1 %v171_v27 }
 0x1c8   :  { %v277_v29 = vpop.f32.mrf.mxu1 }
 0x1c9   :  { %v278_v30 = vadd.f32 %v302_v28, %v277_v29 }
 0x1ca   :  { %v367_v31 = vpop.f32.mrf.mxu1 }
 0x1cb   :  { %284 = vst [vmem:[%s498_s5] sm:$0xff] %v278_v30 }
 0x1cc   :  { %v280_v32 = vpop.f32.mrf.mxu1 }
 0x1cd   :  { %v281_v33 = vadd.f32 %v302_v28, %v280_v32 }
 0x1ce   :  { %v368_v34 = vpop.f32.mrf.mxu1 }
 0x1cf   :  { %285 = vst [vmem:[%s498_s5 + $0x8] sm:$0xff] %v281_v33 }
 0x1d0   :  { %290 = vsyncpa [#allocation3], 1 }
 0x1d1   :  { %291 = vsyncpa [#allocation5], 1 }

</bundles_post_ra>
